<compile_context>
chip_gen: v7x
topology: tpu7x:2x2x1
jax: 0.10.0
libtpu: 0.0.40
codegen_flags: <defaults>
</compile_context>

<pallas_src>
import jax
import jax.numpy as jnp
from jax.experimental import pallas as pl
from jax.experimental.pallas import tpu as pltpu

_LANES = 128

# Native sublane packing per element width: f32 -> 8, bf16/f16 -> 16, 1-byte -> 32.
_SUBLANES = {4: 8, 2: 16, 1: 32}


def _enhance_kernel(img_ref, out_ref):
    # base_detector.enhance_image(img) -> img  (identity): elementwise copy.
    out_ref[...] = img_ref[...]


def enhance_image(img, *, use_kernel=False, tile_bytes=4 * 1024 * 1024,
                  min_kernel_bytes=1 << 20):
    """Pallas implementation of base_detector.enhance_image (identity).

    Default path elides the copy entirely (top perf-review recommendation).
    `use_kernel=True` runs the lane-dense identity-copy Pallas kernel
    (debug / benchmarking only).
    """
    if not use_kernel:
        # Identity: returning the input removes the entire 2*size/HBM_BW cost.
        return img

    itemsize = jnp.dtype(img.dtype).itemsize
    total = img.size
    total_bytes = total * itemsize

    # Small-input bypass: pallas_call launch + per-step overhead would be
    # ~100% of the time on tiny frames.
    if total_bytes < min_kernel_bytes:
        return img

    if total % _LANES != 0:
        # Cannot form a lane-dense 2-D slab; the op is the identity anyway.
        return img

    rows = total // _LANES
    flat = img.reshape(rows, _LANES)

    # Round tile rows to the dtype's native sublane packing so every store is
    # a full unmasked vst (uint8 frames -> 32, bf16 -> 16, f32 -> 8).
    sublanes = _SUBLANES.get(itemsize, 8)
    max_tile_rows = max(
        sublanes,
        (tile_bytes // (_LANES * itemsize) // sublanes) * sublanes,
    )
    tile_rows = rows if rows <= max_tile_rows else max_tile_rows

    grid = (pl.cdiv(rows, tile_rows),)

    # 2-deep double-buffered input + output tiles, plus headroom; explicit so
    # 4 MiB tiles stay portable on v5e's 16 MiB scoped-VMEM default.
    tile_nbytes = tile_rows * _LANES * itemsize
    vmem_limit = min(int(4 * tile_nbytes + (2 << 20)), 128 << 20)

    out = pl.pallas_call(
        _enhance_kernel,
        out_shape=jax.ShapeDtypeStruct((rows, _LANES), img.dtype),
        grid=grid,
        in_specs=[pl.BlockSpec((tile_rows, _LANES), lambda r: (r, 0))],
        out_specs=pl.BlockSpec((tile_rows, _LANES), lambda r: (r, 0)),
        compiler_params=pltpu.CompilerParams(
            dimension_semantics=("parallel",),
            vmem_limit_bytes=vmem_limit),
    )(flat)
    return out.reshape(img.shape)


def base_detector_forward(img, enhance=True, return_image=False, *,
                          use_kernel=False):
    """Mirrors base_detector.forward semantics for the parts defined in-module."""
    if enhance:
        img = enhance_image(img, use_kernel=use_kernel)

    # TODO(synk): self.detector_model (YOLOv5 loaded via torch.hub from a .pt
    # checkpoint), Detection.from_results, BYTETracker.update and
    # match_detections_with_tracks are external, data-dependent components with
    # no in-module tensor definition; they have no Pallas equivalent, so
    # `detections` stays None here.
    detections = None

    result = {
        "detections": detections,
        "enhanced_image": img if return_image else None,
    }
    return result


if __name__ == "__main__":
    key = jax.random.PRNGKey(0)

    # Small NCHW image consistent with the detector's image input.
    img = jax.random.uniform(key, (2, 3, 16, 16), dtype=jnp.float32)

    # Default forward: enhancement identity is elided (no kernel, no copy).
    out = base_detector_forward(img, enhance=True, return_image=True)
    enhanced = jax.block_until_ready(out["enhanced_image"])
    assert enhanced.shape == img.shape and enhanced.dtype == img.dtype
    assert bool(jnp.allclose(enhanced, img))
    assert out["detections"] is None

    # Exercise the Pallas kernel path explicitly (debug/bench flag), multi-tile
    # grid: rows = 192 f32, tile_rows = 32 -> grid = (6,), parallel-sharded.
    img_f32 = jax.random.uniform(jax.random.PRNGKey(1), (1, 3, 64, 128),
                                 dtype=jnp.float32)
    enh_f32 = jax.block_until_ready(
        enhance_image(img_f32, use_kernel=True, tile_bytes=16 * 1024,
                      min_kernel_bytes=0))
    assert enh_f32.shape == img_f32.shape and enh_f32.dtype == img_f32.dtype
    assert bool(jnp.allclose(enh_f32, img_f32))

    # bf16 path exercises the dtype-native (16-row) sublane rounding,
    # full-extent single block.
    img_bf16 = jax.random.uniform(jax.random.PRNGKey(2), (2, 4, 16, 16),
                                  dtype=jnp.float32).astype(jnp.bfloat16)
    enh_bf16 = jax.block_until_ready(
        enhance_image(img_bf16, use_kernel=True, min_kernel_bytes=0))
    assert enh_bf16.shape == img_bf16.shape and enh_bf16.dtype == img_bf16.dtype
    assert bool(jnp.all(enh_bf16 == img_bf16))

    print("KERNEL_OK")
</pallas_src>

<mosaic_0001>
module attributes {stable_mosaic.version = 11 : i64} {
  func.func @_enhance_kernel(%arg0: i32, %arg1: memref<32x128xf32, #tpu.memory_space<vmem>>, %arg2: memref<32x128xf32, #tpu.memory_space<vmem>>) attributes {dimension_semantics = [#tpu.dimension_semantics<parallel>], iteration_bounds = array<i64: 6>, scalar_prefetch = 0 : i64, scratch_operands = 0 : i64, tpu.core_type = #tpu.core_type<tc>, window_params = [{transform_indices = @transform_0, window_bounds = array<i64: 32, 128>}, {transform_indices = @transform_1, window_bounds = array<i64: 32, 128>}]} {
    %c0 = arith.constant 0 : index
    %c0_0 = arith.constant 0 : index
    %0 = vector.load %arg1[%c0, %c0_0] : memref<32x128xf32, #tpu.memory_space<vmem>>, vector<32x128xf32>
    %c0_1 = arith.constant 0 : index
    %c0_2 = arith.constant 0 : index
    %1 = vector.load %arg2[%c0_1, %c0_2] : memref<32x128xf32, #tpu.memory_space<vmem>>, vector<32x128xf32>
    tpu.vector_store %arg2[%c0_1, %c0_2], %0 {strides = array<i32>} : memref<32x128xf32, #tpu.memory_space<vmem>>, vector<32x128xf32>,
    return
  }
  func.func @transform_0(%arg0: i32) -> (i32, i32) {
    %c0_i32 = arith.constant 0 : i32
    %c0_i32_0 = arith.constant 0 : i32
    return %arg0, %c0_i32 : i32, i32
  }
  func.func @transform_1(%arg0: i32) -> (i32, i32) {
    %c0_i32 = arith.constant 0 : i32
    %c0_i32_0 = arith.constant 0 : i32
    return %arg0, %c0_i32 : i32, i32
  }
}

</mosaic_0001>

<bundles_post_ra>
// kernel: tpu_custom_call.1
= control target key start
LH: loop header
LB: loop body
LE: loop exit
PB: predicated region body
PF: predicated region fallthrough
CT: control target
= control target key end

     0   :  { %6 = vsyncpa [#allocation3], 0  ;;  %s572_s0 = inlined_call_operand.hbm [shape: f32[192,128], index: 0, kind: input, shape index: {}]   ;;  %s573_s1 = inlined_call_operand.hbm [shape: f32[192,128], index: 1, kind: output, shape index: {}]  }
   0x1   :  { %8 = vsyncpa [#allocation3 + $0x1], 0 }
   0x2   :  { %9 = vsyncpa [#allocation4], 0 }
   0x3   :  { %11 = vsyncpa [#allocation4 + $0x1], 0  ;;  %s412_s6 = smov 0   ;;  %s414_s7 = smov 0  }
   0x4   :  { %s416_s8 = smov 0   ;;  %s418_s9 = smov 0  }
   0x5 LB: > { %s433_s10 = sadd.s32 4294967295, %s394_s9   ;;  %s232_s11 = sadd.s32 4294967294, %s394_s9   ;;  %s394_s9 = sphi %s418_s9, %s585_s9   ;;  %s390_s8 = sphi %s416_s8, %s584_s8   ;;  %s386_s7 = sphi %s414_s7, %s583_s7   ;;  %s382_s6 = sphi %s412_s6, %s582_s6  }
   0x6   : > { %s437_s12 = sadd.s32 1, %s394_s9   ;;  %s24_s13 = sadd.s32 1, %s390_s8 }
   0x7   : > { %s21_s14 = ssub.s32 %s394_s9, %s437_s12  ;;  %p31_p0 = scmp.ne.s32.totalorder %s390_s8, %s386_s7 }
   0x8   : > { %p22_p1 = scmp.eq.s32.totalorder %s21_s14, 0  ;;  %p32_p2 = scmp.eq.s32.totalorder %s394_s9, 0 }
   0x9   : > { %p37_p3 = scmp.ne.s32.totalorder %s386_s7, %s382_s6  ;;  %p38_p4 = scmp.eq.s32.totalorder %s433_s10, 0 }
   0xa   : > { %s449_s15 = scalar_select %p22_p1, %s390_s8, %s24_s13  }
   0xb   : > { %p451_p5 = por %p32_p2, %p31_p0  ;;  %p455_p6 = por %p38_p4, %p37_p3 }
   0xc   : > { %p61_p7 = scmp.eq.s32.totalorder %s433_s10, 5  ;;  %p67_p8 = scmp.eq.s32.totalorder %s232_s11, 5 }
   0xd   : > { %p260_p9 = scmp.lt.s32.totalorder %s394_s9, 6  ;;  %s87_s20 = sand.u32 1, %s390_s8  }
   0xe   : > { %p461_p10 = por %p61_p7, %p31_p0  ;;  %p465_p11 = por %p67_p8, %p37_p3 }
   0xf   : > { %s246_s21 = sshll.u32 %s394_s9, 9  ;;  %s235_s22 = sshll.u32 %s87_s20, 5 }
  0x10   : > { %s577_s18 = scalar_select %p461_p10, 1, 0 }
  0x11   : > { %s578_s19 = scalar_select %p465_p11, 1, 0 }
  0x12   : > { %s474_s25 = scalar_lea.hbm %s572_s0, %s246_s21  ;;  %s91_s26 = scalar_lea.vmem [#allocation2], %s235_s22 }
  0x13   : > { %s98_s27 = sshll.u32 %s91_s26, 4  ;;  %p478_p12 = pnand %p260_p9, %p451_p5  ;;  %s482_s27 = int_to_ptr.vmem [resolvable:$true] %s98_s27 }
  0x14   : > { %s484_s29 = scalar_lea.sflag [#allocation3], %s87_s20  ;;  %s298_s30 = scalar_lea.hbm %s474_s25, 512 }
  0x15   : > { %p299_p13 = scmp.ne.s32.totalorder %s474_s25, %s298_s30  ;;  %p300_p0 = pneg %p478_p12 }
  0x16   : > { %s303_s4 = scalar_lea.hbm %s572_s0, 3072  ;;  %p304_p3 = scmp.lt.u32.totalorder %s474_s25, %s572_s0 }
  0x17   : > { %p301_p1 = pnand %p300_p0, %p299_p13  ;;  %p305_p4 = scmp.lt.u32.totalorder %s303_s4, %s298_s30 }
  0x18   : > { %p307_p7 = scmp.lt.u32.totalorder %s298_s30, %s474_s25 }
  0x19   : > { %p302_p2 = pneg %p301_p1  ;;  %p306_p5 = por %p305_p4, %p304_p3 }
  0x1b   : > { %p308_p8 = por %p307_p7, %p306_p5 }
  0x1d   : > { %p309_p9 = pnand %p308_p8, %p302_p2 }
  0x1f   : > { %312 = shalt.err (!%p309_p9)
}
  0x20   : > { %s313_s13 = scalar_lea.vmem %s482_s27, 512  ;;  %s396_s14 = smov [#allocation2]  }
  0x21   : > { %p314_p13 = scmp.ne.s32.totalorder %s482_s27, %s313_s13  ;;  %s318_s16 = sshll.u32 %s396_s14, 4  ;;  %s319_s16 = int_to_ptr.vmem [resolvable:$false] %s318_s16 }
  0x22   : > { %s320_s20 = scalar_lea.vmem %s319_s16, 1024  ;;  %p321_p10 = scmp.lt.s32.totalorder %s482_s27, %s319_s16 }
  0x23   : > { %p316_p1 = pnand %p314_p13, %p300_p0  ;;  %p322_p3 = scmp.lt.s32.totalorder %s320_s20, %s313_s13 }
  0x25   : > { %p317_p11 = pneg %p316_p1  ;;  %p323_p4 = por %p322_p3, %p321_p10 }
  0x27   : > { %p324_p5 = pnand %p323_p4, %p317_p11 }
  0x29   : > { %327 = shalt.err (!%p324_p5)
}
  0x2a   : > { %s397_s21 = smov 128   ;;  %s398_s22 = smov 8  }
  0x2b   : > { %255 = dma.hbm_to_vmem [thread:$0]  (!%p478_p12), %s474_s25, 512, %s482_s27, %s484_s29, %s397_s21, %s397_s21, %s398_s22  }
  0x2c   : > { %p238_p0 = scmp.ge.s32.totalorder %s394_s9, 1  ;;  %p106_p2 = scmp.lt.s32.totalorder %s394_s9, 7 }
  0x2e   : > { %p107_p7 = pnand %p238_p0, %p106_p2 }
  0x2f   : > { %s515_s23 = sand.u32 (!%p107_p7), 1, %s386_s7  }
  0x30   : > { %110 = sbr.rel (%p107_p7) target bundleno = 83 (0x53), region = 24  ;;  %s239_s24 = sshll.u32 (!%p107_p7), %s515_s23, 5 }
  0x31   : > { %s113_s26 = scalar_lea.sflag (!%p107_p7), [#allocation3], %s515_s23  ;;  %s116_s30 = scalar_lea.vmem (!%p107_p7), [#allocation2], %s239_s24 }
  0x37   : > { %373 = dma.done.wait (%p455_p6), %s113_s26, 512  }
  0x38   : > { %375 = vsyncadd (%p455_p6), %s113_s26, 4294966784  ;;  %s134_s25 = scalar_lea.vmem [#allocation5], %s239_s24  ;;  %s247_s28 = sshll.u32 %s433_s10, 9  ;;  %v137_v0 = vld [vmem:[%s116_s30] sm:$0xff]  ;;  %v138_v1 = vld [vmem:[%s116_s30 + $0x8] sm:$0xff] }
  0x39   : > { %s159_s27 = sshll.u32 %s134_s25, 4  ;;  %s529_s3 = scalar_lea.hbm %s573_s1, %s247_s28  ;;  %v139_v2 = vld [vmem:[%s116_s30 + $0x10] sm:$0xff]  ;;  %141 = vst [vmem:[%s134_s25] sm:$0xff] %v137_v0  ;;  %142 = vst [vmem:[%s134_s25 + $0x8] sm:$0xff] %v138_v1  ;;  %v140_v3 = vld [vmem:[%s116_s30 + $0x18] sm:$0xff]  ;;  %s524_s27 = int_to_ptr.vmem [resolvable:$true] %s159_s27 }
  0x3a   : > { %143 = vst [vmem:[%s134_s25 + $0x10] sm:$0xff] %v139_v2  ;;  %144 = vst [vmem:[%s134_s25 + $0x18] sm:$0xff] %v140_v3  ;;  %s146_s17 = scalar_lea.sflag [#allocation4], %s515_s23  ;;  %s328_s10 = scalar_lea.vmem %s524_s27, 512 }
  0x3b   : > { %p329_p6 = scmp.ne.s32.totalorder %s524_s27, %s328_s10  ;;  %p580_p10 = scmp.ne.s32.totalorder %s577_s18, 0 }
  0x3c   : > { %s399_s4 = smov [#allocation5]  }
  0x3d   : > { %p330_p11 = pnand %p329_p6, %p580_p10  ;;  %s332_s5 = sshll.u32 %s399_s4, 4  ;;  %s333_s5 = int_to_ptr.vmem [resolvable:$false] %s332_s5 }
  0x3e   : > { %s334_s11 = scalar_lea.vmem %s333_s5, 1024  ;;  %p335_p8 = scmp.lt.s32.totalorder %s524_s27, %s333_s5 }
  0x3f   : > { %p331_p12 = pneg %p330_p11  ;;  %p336_p9 = scmp.lt.s32.totalorder %s334_s11, %s328_s10 }
  0x41   : > { %p337_p13 = por %p336_p9, %p335_p8 }
  0x43   : > { %p338_p1 = pnand %p337_p13, %p331_p12 }
  0x45   : > { %341 = shalt.err (!%p338_p1)
}
  0x46   : > { %s342_s13 = scalar_lea.hbm %s529_s3, 512  ;;  %s346_s20 = scalar_lea.hbm %s573_s1, 3072 }
  0x47   : > { %p343_p3 = scmp.ne.s32.totalorder %s529_s3, %s342_s13  ;;  %p347_p0 = scmp.lt.u32.totalorder %s529_s3, %s573_s1 }
  0x48   : > { %p348_p2 = scmp.lt.u32.totalorder %s346_s20, %s342_s13  ;;  %p350_p6 = scmp.lt.u32.totalorder %s342_s13, %s529_s3 }
  0x49   : > { %p344_p4 = pnand %p343_p3, %p580_p10 }
  0x4a   : > { %p349_p7 = por %p348_p2, %p347_p0 }
  0x4b   : > { %p345_p5 = pneg %p344_p4 }
  0x4c   : > { %p351_p11 = por %p350_p6, %p349_p7 }
  0x4e   : > { %p352_p12 = pnand %p351_p11, %p345_p5 }
  0x50   : > { %355 = shalt.err (!%p352_p12)
}
  0x51   : > { %s400_s24 = smov 128   ;;  %s401_s26 = smov 8  }
  0x52   : > { %250 = dma.vmem_to_hbm [thread:$0]  (%p580_p10), %s524_s27, 512, %s529_s3, %s146_s17, %s400_s24, %s400_s24, %s401_s26  }
  0x53 PF: > { %p261_p8 = scmp.ge.s32.totalorder %s394_s9, 2  ;;  %s174_s30 = sand.u32 1, %s382_s6  }
  0x54   : > { %p581_p9 = scmp.ne.s32.totalorder %s578_s19, 0  ;;  %s175_s25 = scalar_lea.sflag [#allocation4], %s174_s30 }
  0x56   : > { %p257_p13 = pnand %p261_p8, %p581_p9 }
  0x58   : > { %377 = dma.done.wait (!%p257_p13), %s175_s25, 512  }
  0x59   : > { %379 = vsyncadd (!%p257_p13), %s175_s25, 4294966784  ;;  %p14_p1 = scmp.ge.s32.totalorder %s437_s12, 8   ;;  %s582_s6 = smov %s386_s7 }
  0x5a   : > { %s583_s7 = smov %s390_s8  ;;  %s584_s8 = smov %s449_s15 }
  0x5b   : > { %s585_s9 = smov %s437_s12  ;;  %16 = sbr.rel (!%p14_p1) target bundleno = 5 (0x5), region = 69 }
  0x62   :  { %180 = vsyncpa [#allocation3], 1 }
  0x63   :  { %182 = vsyncpa [#allocation3 + $0x1], 1 }
  0x64   :  { %183 = vsyncpa [#allocation4], 1 }
  0x65   :  { %185 = vsyncpa [#allocation4 + $0x1], 1 }

</bundles_post_ra>
